<compile_context>
chip_gen: v5e
topology: v5e:2x2
jax: 0.10.0
libtpu: 0.0.40
codegen_flags: <defaults>
</compile_context>

<pallas_src>
import jax
import jax.numpy as jnp
from jax.experimental import pallas as pl
from jax.experimental.pallas import tpu as pltpu


def _make_pe(max_len: int, d_model: int) -> jnp.ndarray:
    """Sinusoidal table identical to the torch __init__ (f32, (max_len, d_model))."""
    position = jnp.arange(0, max_len, dtype=jnp.float32)[:, None]
    div_term = jnp.exp(
        jnp.arange(0, d_model, 2, dtype=jnp.float32)
        * (-jnp.log(jnp.float32(10000.0)) / d_model)
    )
    pe = jnp.zeros((max_len, d_model), dtype=jnp.float32)
    pe = pe.at[:, 0::2].set(jnp.sin(position * div_term))
    # Guard odd d_model (torch code assumes even d): cos columns are floor(d/2) wide.
    pe = pe.at[:, 1::2].set(jnp.cos(position * div_term[: d_model // 2]))
    return pe


def _add_pe_kernel(x_ref, pe_ref, o_ref):
    # x_ref / o_ref: (TB, TC) tile of the flattened (batch, seq*d) view.
    # pe_ref:        (1, TC)  matching slice of the flattened pe row (x.dtype).
    o_ref[...] = (x_ref[...] + pe_ref[...]).astype(o_ref.dtype)


def _round_down(a: int, m: int) -> int:
    return (a // m) * m


_SUBLANE_PACK = {4: 8, 2: 16, 1: 32}


def _choose_tiles(b: int, n: int, itemsize: int,
                  target_bytes: int = 6 << 20,
                  vmem_budget_bytes: int = 32 << 20):
    """Pick (row_tile, col_tile) for the flattened (b, n) broadcast add.

    The column tile is lane-dense (multiple of 128) unless it covers the full
    row; the row tile is a multiple of the dtype's sublane pack unless it covers
    the full batch.  Sizing targets ~target_bytes of *real* data per grid step
    (using min(b, sublane_pack) effective rows so small batches still get
    full-size steps) while keeping the sublane-padded, double-buffered VMEM
    footprint (2x x + 2x out + 2x pe) inside vmem_budget_bytes.
    """
    sub = _SUBLANE_PACK.get(itemsize, 8)
    eff_rows = min(b, sub)          # rows of real data in a minimal row tile
    pad_rows = sub                  # sublane-padded rows of that tile in VMEM

    tc_cap = min(
        target_bytes // (eff_rows * itemsize),            # hit the data target
        vmem_budget_bytes // (6 * pad_rows * itemsize),    # 6 padded buffers fit
    )
    max_tc = max(128, _round_down(tc_cap, 128))
    tc = n if n <= max_tc else max_tc

    rows_budget = max(eff_rows, target_bytes // max(1, tc * itemsize))
    tb = b if b <= rows_budget else max(sub, _round_down(rows_budget, sub))

    # Avoid a degenerate single-step grid (keeps both v7x TensorCores busy).
    if tb >= b and tc >= n and n >= 2 * 128:
        tc = max(128, _round_down(-(-n // 2), 128))        # ceil(n/2), 128-aligned
    return tb, tc


@jax.jit
def _add_pe(x: jnp.ndarray, pe2: jnp.ndarray) -> jnp.ndarray:
    """x: (batch, seq_len, d_model); pe2: (1, seq_len*d_model) in x.dtype."""
    b, s, d = x.shape
    n = s * d
    x2 = x.reshape(b, n)                                   # lane-dense flattened view

    itemsize = jnp.dtype(x.dtype).itemsize
    tb, tc = _choose_tiles(b, n, itemsize)
    # Column tiles on the OUTER axis, batch tiles INNER: the pe block index is
    # constant across consecutive steps, so Pallas skips its re-DMA.
    grid = (pl.cdiv(n, tc), pl.cdiv(b, tb))

    out2 = pl.pallas_call(
        _add_pe_kernel,
        out_shape=jax.ShapeDtypeStruct((b, n), x.dtype),
        grid_spec=pltpu.PrefetchScalarGridSpec(
            num_scalar_prefetch=0,
            grid=grid,
            in_specs=[
                pl.BlockSpec((tb, tc), lambda j, i: (i, j)),   # x tile
                pl.BlockSpec((1, tc), lambda j, i: (0, j)),    # pe slice (batch-shared)
            ],
            out_specs=pl.BlockSpec((tb, tc), lambda j, i: (i, j)),
        ),
        compiler_params=pltpu.CompilerParams(
            dimension_semantics=("parallel", "parallel"),
            vmem_limit_bytes=42 << 20,
        ),
    )(x2, pe2)

    return out2.reshape(b, s, d)


class PositionalEncoding:
    """Pallas-backed sinusoidal positional encoding (forward of the torch module)."""

    def __init__(self, d_model: int, max_len: int = 5000):
        self.d_model = d_model
        self.max_len = max_len
        self.pe = _make_pe(max_len, d_model)       # f32 buffer, like register_buffer
        self._pe_flat_cache = {}                   # (seq_len, dtype) -> (1, s*d) array

    def _pe_flat(self, seq_len: int, dtype) -> jnp.ndarray:
        key = (seq_len, jnp.dtype(dtype).str)
        if key not in self._pe_flat_cache:
            pe2 = (self.pe[:seq_len].astype(dtype)
                   .reshape(1, seq_len * self.d_model))
            self._pe_flat_cache[key] = jax.block_until_ready(pe2)
        return self._pe_flat_cache[key]

    def __call__(self, x: jnp.ndarray) -> jnp.ndarray:
        b, s, d = x.shape
        if d != self.d_model:
            raise ValueError(f"d_model mismatch: x has {d}, module has {self.d_model}")
        if s > self.max_len:
            raise ValueError(f"seq_len {s} exceeds max_len {self.max_len}")
        return _add_pe(x, self._pe_flat(s, x.dtype))


if __name__ == "__main__":
    d_model = 32
    max_len = 5000
    batch = 2
    seq_len = 8

    key = jax.random.PRNGKey(0)
    x = jax.random.normal(key, (batch, seq_len, d_model), dtype=jnp.float32)

    module = PositionalEncoding(d_model, max_len)
    out = jax.block_until_ready(module(x))

    # Reference: plain-JAX broadcast add, matching the torch forward.
    ref = x + module.pe[:seq_len][None, :, :]
    assert out.shape == x.shape
    assert jnp.allclose(out, ref, atol=1e-6, rtol=1e-6)

    print("KERNEL_OK")
</pallas_src>

<mosaic_0001>
module attributes {stable_mosaic.version = 11 : i64} {
  func.func @_add_pe_kernel(%arg0: i32, %arg1: i32, %arg2: memref<2x128xf32, #tpu.memory_space<vmem>>, %arg3: memref<1x128xf32, #tpu.memory_space<vmem>>, %arg4: memref<2x128xf32, #tpu.memory_space<vmem>>) attributes {dimension_semantics = [#tpu.dimension_semantics<parallel>, #tpu.dimension_semantics<parallel>], iteration_bounds = array<i64: 2, 1>, scalar_prefetch = 0 : i64, scratch_operands = 0 : i64, tpu.core_type = #tpu.core_type<tc>, window_params = [{transform_indices = @transform_0, window_bounds = array<i64: 2, 128>}, {transform_indices = @transform_1, window_bounds = array<i64: 1, 128>}, {transform_indices = @transform_2, window_bounds = array<i64: 2, 128>}]} {
    %c0 = arith.constant 0 : index
    %c0_0 = arith.constant 0 : index
    %0 = vector.load %arg2[%c0, %c0_0] : memref<2x128xf32, #tpu.memory_space<vmem>>, vector<2x128xf32>
    %c0_1 = arith.constant 0 : index
    %c0_2 = arith.constant 0 : index
    %1 = vector.load %arg3[%c0_1, %c0_2] : memref<1x128xf32, #tpu.memory_space<vmem>>, vector<1x128xf32>
    %2 = vector.broadcast %1 : vector<1x128xf32> to vector<2x128xf32>
    %3 = arith.addf %0, %2 : vector<2x128xf32>
    %c0_3 = arith.constant 0 : index
    %c0_4 = arith.constant 0 : index
    %4 = vector.load %arg4[%c0_3, %c0_4] : memref<2x128xf32, #tpu.memory_space<vmem>>, vector<2x128xf32>
    tpu.vector_store %arg4[%c0_3, %c0_4], %3 {strides = array<i32>} : memref<2x128xf32, #tpu.memory_space<vmem>>, vector<2x128xf32>,
    return
  }
  func.func @transform_0(%arg0: i32, %arg1: i32) -> (i32, i32) {
    %c0_i32 = arith.constant 0 : i32
    return %arg1, %arg0 : i32, i32
  }
  func.func @transform_1(%arg0: i32, %arg1: i32) -> (i32, i32) {
    %c0_i32 = arith.constant 0 : i32
    %c0_i32_0 = arith.constant 0 : i32
    return %c0_i32, %arg0 : i32, i32
  }
  func.func @transform_2(%arg0: i32, %arg1: i32) -> (i32, i32) {
    %c0_i32 = arith.constant 0 : i32
    return %arg1, %arg0 : i32, i32
  }
}

</mosaic_0001>

<bundles_post_ra>
// kernel: _add_pe.1
= control target key start
LH: loop header
LB: loop body
LE: loop exit
PB: predicated region body
PF: predicated region fallthrough
CT: control target
= control target key end

     0   :  { %s361_s9 = smov 0   ;;  %s363_s10 = smov 0   ;;  %s380_s0 = inlined_call_operand.vmem [shape: f32[2,256], index: 0, kind: input, shape index: {}]   ;;  %s381_s1 = inlined_call_operand.vmem [shape: f32[1,256], index: 1, kind: input, shape index: {}]   ;;  %s382_s2 = inlined_call_operand.vmem [shape: f32[2,256], index: 2, kind: output, shape index: {}]  }
   0x1   :  { %s342_s11 = smov 0  }
   0x2 LB: > { %s24_s12 = sadd.s32 1, %s340_s10  ;;  %p292_p0 = scmp.ge.s32.totalorder %s344_s11, 1  ;;  %s344_s11 = sphi %s342_s11, %s12_s11   ;;  %s340_s10 = sphi %s363_s10, %s384_s10   ;;  %s336_s9 = sphi %s361_s9, %s383_s9  }
   0x3   : > { %p26_p1 = scmp.ge.s32.totalorder %s24_s12, 2  ;;  %p139_p2 = scmp.lt.s32.totalorder %s344_s11, 3 }
   0x5   : > { %s386_s12 = smov (%p26_p1, %s24_s12), 0  ;;  %p140_p3 = pnand %p292_p0, %p139_p2 }
   0x6   : > { %p172_p4 = scmp.lt.s32.totalorder (!%p140_p3), %s336_s9, 1 }
   0x7   : > { %143 = sbr.rel (%p140_p3) target bundleno = 19 (0x13), region = 28 }
   0xc   : > { %s388_s9 = smov (!%p172_p4, %s336_s9), 1 }
   0xd   : > { %s293_s13 = sshll.u32 %s388_s9, 1  ;;  %s180_s16 = scalar_lea.vmem %s381_s1, %s388_s9 }
   0xe   : > { %s177_s19 = scalar_lea.vmem %s380_s0, %s293_s13  ;;  %v321_v0 = vld [vmem:[%s180_s16] ss:$0 sm:$0xff]  ;;  %s188_s22 = scalar_lea.vmem %s382_s2, %s293_s13 }
   0xf   : > { %v189_v1 = vld [vmem:[%s177_s19] sm:$0x3] }
  0x10   : > { %v194_v2 = vadd.f32 %v321_v0, %v189_v1 }
  0x12   : > { %195 = vst [vmem:[%s188_s22] sm:$0x3] %v194_v2 }
  0x13 PF: > { %s12_s11 = sadd.s32 1, %s344_s11   ;;  %s383_s9 = smov %s340_s10 }
  0x14   : > { %p9_p5 = scmp.ge.s32.totalorder %s12_s11, 4   ;;  %s384_s10 = smov %s386_s12 }
  0x16   :  { %11 = sbr.rel (!%p9_p5) target bundleno = 2 (0x2), region = 61 }

</bundles_post_ra>
